<compile_context>
chip_gen: v6e
topology: v6e:2x2x1
jax: 0.10.0
libtpu: 0.0.40
codegen_flags: <defaults>
</compile_context>

<pallas_src>
import functools

import jax
import jax.numpy as jnp
from jax.experimental import pallas as pl
from jax.experimental.pallas import tpu as pltpu

_LANE = 128      # lane width (last dim)
_SUBLANE = 8     # sublane width (second-to-last dim)


def _round_up(x: int, m: int) -> int:
    return ((x + m - 1) // m) * m


def _mlp_kernel(*refs, num_layers: int, compute_dtype):
    """Fused MLP for one row tile: refs = (x, w0, b0, ..., wL-1, bL-1, out)."""
    x_ref = refs[0]
    o_ref = refs[-1]
    wb = refs[1:-1]

    h = x_ref[...]                                   # (tm, d0) compute dtype
    for layer in range(num_layers):
        w = wb[2 * layer][...]                       # (d_in, d_out) compute dtype
        b = wb[2 * layer + 1][...]                   # (1, d_out) f32
        acc = jnp.dot(h, w, preferred_element_type=jnp.float32)
        acc = acc + b                                # broadcast bias over rows
        if layer < num_layers - 1:
            # TODO(synk): training-mode dropout (p=0.5) not implemented; the
            # PyTorch forward in eval mode reduces dropout to identity.
            acc = jnp.maximum(acc, 0.0)              # ReLU between layers
            h = acc.astype(compute_dtype)            # stays in vregs/VMEM
        else:
            o_ref[...] = acc.astype(o_ref.dtype)


def mlp_forward(x, params, *, tm: int = 256, compute_dtype=jnp.bfloat16):
    """Forward pass matching MLP.forward in eval mode.

    x:      [N, starting_features]
    params: list of (W, b) with W stored as [in_features, out_features].
    """
    n, f_in = x.shape
    num_layers = len(params)
    out_dtype = x.dtype
    out_features = params[-1][0].shape[1]

    # ---- lane-dense feature dims (multiples of 128) -------------------------
    dims = [f_in] + [w.shape[1] for w, _ in params]
    dims_p = [_round_up(d, _LANE) for d in dims]

    # ---- row tiling: large tm, pad N instead of asserting divisibility ------
    tm = max(_SUBLANE, min(_round_up(tm, _SUBLANE), _round_up(n, _SUBLANE)))
    n_p = _round_up(n, tm)
    num_tiles = n_p // tm

    # ---- padded operands -----------------------------------------------------
    x_p = jnp.zeros((n_p, dims_p[0]), compute_dtype)
    x_p = x_p.at[:n, :f_in].set(x.astype(compute_dtype))

    flat_inputs = [x_p]
    in_specs = [pl.BlockSpec((tm, dims_p[0]), lambda i: (i, 0))]
    for layer, (w, b) in enumerate(params):
        d_in, d_out = w.shape
        din_p, dout_p = dims_p[layer], dims_p[layer + 1]
        w_p = jnp.zeros((din_p, dout_p), compute_dtype)
        w_p = w_p.at[:d_in, :d_out].set(w.astype(compute_dtype))
        b_p = jnp.zeros((1, dout_p), jnp.float32)
        b_p = b_p.at[0, :d_out].set(b.astype(jnp.float32))
        flat_inputs += [w_p, b_p]
        in_specs += [
            pl.BlockSpec((din_p, dout_p), lambda i: (0, 0)),  # weight: resident
            pl.BlockSpec((1, dout_p), lambda i: (0, 0)),      # bias: resident
        ]

    # ---- explicit VMEM budget (v7x has only 64 MiB physical) ----------------
    cbytes = jnp.dtype(compute_dtype).itemsize
    obytes = jnp.dtype(out_dtype).itemsize
    est = 2 * tm * dims_p[0] * cbytes                 # double-buffered x tiles
    est += 2 * tm * dims_p[-1] * obytes               # double-buffered out tiles
    for layer in range(num_layers):
        est += 2 * dims_p[layer] * dims_p[layer + 1] * cbytes   # weights
        est += 2 * dims_p[layer + 1] * 4                        # biases (f32)
        est += tm * dims_p[layer + 1] * 4                       # live f32 acc
    vmem_limit = int(min(48 * 1024 * 1024, max(32 * 1024 * 1024, 4 * est)))

    # ---- advisory cost estimate for the XLA scheduler ------------------------
    flops = sum(2 * n_p * dims_p[l] * dims_p[l + 1] for l in range(num_layers))
    bytes_accessed = (
        n_p * dims_p[0] * cbytes
        + n_p * dims_p[-1] * obytes
        + sum(dims_p[l] * dims_p[l + 1] * cbytes + dims_p[l + 1] * 4
              for l in range(num_layers)))
    cost = pl.CostEstimate(flops=flops, transcendentals=0,
                           bytes_accessed=bytes_accessed)

    kernel = functools.partial(
        _mlp_kernel, num_layers=num_layers, compute_dtype=compute_dtype)

    out_p = pl.pallas_call(
        kernel,
        out_shape=jax.ShapeDtypeStruct((n_p, dims_p[-1]), out_dtype),
        grid_spec=pltpu.PrefetchScalarGridSpec(
            num_scalar_prefetch=0,
            grid=(num_tiles,),
            in_specs=in_specs,
            out_specs=pl.BlockSpec((tm, dims_p[-1]), lambda i: (i, 0)),
        ),
        compiler_params=pltpu.CompilerParams(
            dimension_semantics=("parallel",),   # shard row tiles across TCs
            vmem_limit_bytes=vmem_limit,
        ),
        cost_estimate=cost,
    )(*flat_inputs)

    return out_p[:n, :out_features]


def init_mlp_params(key, starting_features, hidden_channels, output_features,
                    dtype=jnp.float32):
    """Deterministic PyTorch-Linear-style init (uniform +-1/sqrt(fan_in))."""
    dims = [starting_features] + list(hidden_channels) + [output_features]
    params = []
    for f_in, f_out in zip(dims[:-1], dims[1:]):
        key, kw, kb = jax.random.split(key, 3)
        bound = 1.0 / (f_in ** 0.5)
        w = jax.random.uniform(kw, (f_in, f_out), dtype, -bound, bound)
        b = jax.random.uniform(kb, (f_out,), dtype, -bound, bound)
        params.append((w, b))
    return params


def mlp_reference(x, params, compute_dtype=jnp.bfloat16):
    """Plain-JAX reference with the same cast pattern (bf16 operands, f32 acc)."""
    h = x.astype(compute_dtype)
    for w, b in params[:-1]:
        y = jnp.dot(h, w.astype(compute_dtype),
                    preferred_element_type=jnp.float32) + b
        h = jnp.maximum(y, 0.0).astype(compute_dtype)
    w, b = params[-1]
    return (jnp.dot(h, w.astype(compute_dtype),
                    preferred_element_type=jnp.float32) + b).astype(x.dtype)


if __name__ == "__main__":
    key = jax.random.PRNGKey(0)
    k_x, k_p = jax.random.split(key)

    # Small shapes consistent with the module; N deliberately NOT a multiple of
    # the row tile to exercise the padding path, and > tm so the grid has
    # multiple steps (megacore sharding).
    N = 200
    starting_features = 32
    hidden_channels = [64, 32]
    output_features = 16

    x = jax.random.normal(k_x, (N, starting_features), dtype=jnp.float32)
    params = init_mlp_params(k_p, starting_features, hidden_channels,
                             output_features)

    out = mlp_forward(x, params, tm=128)
    out = jax.block_until_ready(out)

    ref = mlp_reference(x, params)
    assert out.shape == (N, output_features)
    assert jnp.allclose(out, ref, atol=1e-2, rtol=1e-2), float(
        jnp.max(jnp.abs(out - ref)))

    print("KERNEL_OK")
</pallas_src>

<mosaic_0001>
module attributes {stable_mosaic.version = 11 : i64} {
  func.func @_mlp_kernel(%arg0: i32, %arg1: memref<128x128xbf16, #tpu.memory_space<vmem>>, %arg2: memref<128x128xbf16, #tpu.memory_space<vmem>>, %arg3: memref<1x128xf32, #tpu.memory_space<vmem>>, %arg4: memref<128x128xbf16, #tpu.memory_space<vmem>>, %arg5: memref<1x128xf32, #tpu.memory_space<vmem>>, %arg6: memref<128x128xbf16, #tpu.memory_space<vmem>>, %arg7: memref<1x128xf32, #tpu.memory_space<vmem>>, %arg8: memref<128x128xf32, #tpu.memory_space<vmem>>) attributes {dimension_semantics = [#tpu.dimension_semantics<parallel>], iteration_bounds = array<i64: 2>, scalar_prefetch = 0 : i64, scratch_operands = 0 : i64, tpu.core_type = #tpu.core_type<tc>, window_params = [{transform_indices = @transform_0, window_bounds = array<i64: 128, 128>}, {pipeline_mode = #tpu.pipeline_mode<synchronous>, transform_indices = @transform_1, window_bounds = array<i64: 128, 128>}, {pipeline_mode = #tpu.pipeline_mode<synchronous>, transform_indices = @transform_2, window_bounds = array<i64: 1, 128>}, {pipeline_mode = #tpu.pipeline_mode<synchronous>, transform_indices = @transform_3, window_bounds = array<i64: 128, 128>}, {pipeline_mode = #tpu.pipeline_mode<synchronous>, transform_indices = @transform_4, window_bounds = array<i64: 1, 128>}, {pipeline_mode = #tpu.pipeline_mode<synchronous>, transform_indices = @transform_5, window_bounds = array<i64: 128, 128>}, {pipeline_mode = #tpu.pipeline_mode<synchronous>, transform_indices = @transform_6, window_bounds = array<i64: 1, 128>}, {transform_indices = @transform_7, window_bounds = array<i64: 128, 128>}]} {
    %c0 = arith.constant 0 : index
    %c0_0 = arith.constant 0 : index
    %0 = vector.load %arg1[%c0, %c0_0] : memref<128x128xbf16, #tpu.memory_space<vmem>>, vector<128x128xbf16>
    %c0_1 = arith.constant 0 : index
    %c0_2 = arith.constant 0 : index
    %1 = vector.load %arg2[%c0_1, %c0_2] : memref<128x128xbf16, #tpu.memory_space<vmem>>, vector<128x128xbf16>
    %c0_3 = arith.constant 0 : index
    %c0_4 = arith.constant 0 : index
    %2 = vector.load %arg3[%c0_3, %c0_4] : memref<1x128xf32, #tpu.memory_space<vmem>>, vector<1x128xf32>
    %cst = arith.constant dense<0.000000e+00> : vector<128x128xf32>
    %3 = tpu.matmul %0, %1, %cst {dimension_numbers = #tpu.dot_dimension_numbers<[1], [0], [0], [1], [0, 0, 1, 1], [], []>} : vector<128x128xbf16>, vector<128x128xbf16>, vector<128x128xf32> -> vector<128x128xf32>
    %4 = vector.broadcast %2 : vector<1x128xf32> to vector<128x128xf32>
    %5 = arith.addf %3, %4 : vector<128x128xf32>
    %cst_5 = arith.constant 0.000000e+00 : f32
    %6 = vector.broadcast %cst_5 : f32 to vector<128x128xf32>
    %7 = arith.maximumf %5, %6 : vector<128x128xf32>
    %8 = arith.truncf %7 : vector<128x128xf32> to vector<128x128xbf16>
    %c0_6 = arith.constant 0 : index
    %c0_7 = arith.constant 0 : index
    %9 = vector.load %arg4[%c0_6, %c0_7] : memref<128x128xbf16, #tpu.memory_space<vmem>>, vector<128x128xbf16>
    %c0_8 = arith.constant 0 : index
    %c0_9 = arith.constant 0 : index
    %10 = vector.load %arg5[%c0_8, %c0_9] : memref<1x128xf32, #tpu.memory_space<vmem>>, vector<1x128xf32>
    %cst_10 = arith.constant dense<0.000000e+00> : vector<128x128xf32>
    %11 = tpu.matmul %8, %9, %cst_10 {dimension_numbers = #tpu.dot_dimension_numbers<[1], [0], [0], [1], [0, 0, 1, 1], [], []>} : vector<128x128xbf16>, vector<128x128xbf16>, vector<128x128xf32> -> vector<128x128xf32>
    %12 = vector.broadcast %10 : vector<1x128xf32> to vector<128x128xf32>
    %13 = arith.addf %11, %12 : vector<128x128xf32>
    %cst_11 = arith.constant 0.000000e+00 : f32
    %14 = vector.broadcast %cst_11 : f32 to vector<128x128xf32>
    %15 = arith.maximumf %13, %14 : vector<128x128xf32>
    %16 = arith.truncf %15 : vector<128x128xf32> to vector<128x128xbf16>
    %c0_12 = arith.constant 0 : index
    %c0_13 = arith.constant 0 : index
    %17 = vector.load %arg6[%c0_12, %c0_13] : memref<128x128xbf16, #tpu.memory_space<vmem>>, vector<128x128xbf16>
    %c0_14 = arith.constant 0 : index
    %c0_15 = arith.constant 0 : index
    %18 = vector.load %arg7[%c0_14, %c0_15] : memref<1x128xf32, #tpu.memory_space<vmem>>, vector<1x128xf32>
    %cst_16 = arith.constant dense<0.000000e+00> : vector<128x128xf32>
    %19 = tpu.matmul %16, %17, %cst_16 {dimension_numbers = #tpu.dot_dimension_numbers<[1], [0], [0], [1], [0, 0, 1, 1], [], []>} : vector<128x128xbf16>, vector<128x128xbf16>, vector<128x128xf32> -> vector<128x128xf32>
    %20 = vector.broadcast %18 : vector<1x128xf32> to vector<128x128xf32>
    %21 = arith.addf %19, %20 : vector<128x128xf32>
    %c0_17 = arith.constant 0 : index
    %c0_18 = arith.constant 0 : index
    %22 = vector.load %arg8[%c0_17, %c0_18] : memref<128x128xf32, #tpu.memory_space<vmem>>, vector<128x128xf32>
    tpu.vector_store %arg8[%c0_17, %c0_18], %21 {strides = array<i32>} : memref<128x128xf32, #tpu.memory_space<vmem>>, vector<128x128xf32>,
    return
  }
  func.func @transform_0(%arg0: i32) -> (i32, i32) {
    %c0_i32 = arith.constant 0 : i32
    %c0_i32_0 = arith.constant 0 : i32
    return %arg0, %c0_i32 : i32, i32
  }
  func.func @transform_1(%arg0: i32) -> (i32, i32) {
    %c0_i32 = arith.constant 0 : i32
    %c0_i32_0 = arith.constant 0 : i32
    %c0_i32_1 = arith.constant 0 : i32
    return %c0_i32, %c0_i32_0 : i32, i32
  }
  func.func @transform_2(%arg0: i32) -> (i32, i32) {
    %c0_i32 = arith.constant 0 : i32
    %c0_i32_0 = arith.constant 0 : i32
    %c0_i32_1 = arith.constant 0 : i32
    return %c0_i32, %c0_i32_0 : i32, i32
  }
  func.func @transform_3(%arg0: i32) -> (i32, i32) {
    %c0_i32 = arith.constant 0 : i32
    %c0_i32_0 = arith.constant 0 : i32
    %c0_i32_1 = arith.constant 0 : i32
    return %c0_i32, %c0_i32_0 : i32, i32
  }
  func.func @transform_4(%arg0: i32) -> (i32, i32) {
    %c0_i32 = arith.constant 0 : i32
    %c0_i32_0 = arith.constant 0 : i32
    %c0_i32_1 = arith.constant 0 : i32
    return %c0_i32, %c0_i32_0 : i32, i32
  }
  func.func @transform_5(%arg0: i32) -> (i32, i32) {
    %c0_i32 = arith.constant 0 : i32
    %c0_i32_0 = arith.constant 0 : i32
    %c0_i32_1 = arith.constant 0 : i32
    return %c0_i32, %c0_i32_0 : i32, i32
  }
  func.func @transform_6(%arg0: i32) -> (i32, i32) {
    %c0_i32 = arith.constant 0 : i32
    %c0_i32_0 = arith.constant 0 : i32
    %c0_i32_1 = arith.constant 0 : i32
    return %c0_i32, %c0_i32_0 : i32, i32
  }
  func.func @transform_7(%arg0: i32) -> (i32, i32) {
    %c0_i32 = arith.constant 0 : i32
    %c0_i32_0 = arith.constant 0 : i32
    return %arg0, %c0_i32 : i32, i32
  }
}

</mosaic_0001>

<bundles_post_ra>
// kernel: tpu_custom_call.1
= control target key start
LH: loop header
LB: loop body
LE: loop exit
PB: predicated region body
PF: predicated region fallthrough
CT: control target
= control target key end

     0   :  { %s1908_s0 = inlined_call_operand.hbm [shape: bf16[256,128], index: 0, kind: input, shape index: {}]   ;;  %s1909_s1 = inlined_call_operand.hbm [shape: bf16[128,128], index: 1, kind: input, shape index: {}]   ;;  %s1910_s2 = inlined_call_operand.vmem [shape: f32[1,128], index: 2, kind: input, shape index: {}]   ;;  %s1911_s3 = inlined_call_operand.hbm [shape: bf16[128,128], index: 3, kind: input, shape index: {}]   ;;  %s1912_s4 = inlined_call_operand.vmem [shape: f32[1,128], index: 4, kind: input, shape index: {}]   ;;  %s1913_s5 = inlined_call_operand.hbm [shape: bf16[128,128], index: 5, kind: input, shape index: {}]   ;;  %s1914_s6 = inlined_call_operand.vmem [shape: f32[1,128], index: 6, kind: input, shape index: {}]   ;;  %s1915_s7 = inlined_call_operand.hbm [shape: f32[256,128], index: 7, kind: output, shape index: {}]  }
   0x1   :  { %1922 = sst [smem:[#allocation15_spill]] %s1909_s1 }
   0x2   :  { %12 = vsyncpa [#allocation3], 0 }
   0x3   :  { %14 = vsyncpa [#allocation3 + $0x1], 0 }
   0x4   :  { %15 = vsyncpa [#allocation6], 0 }
   0x5   :  { %16 = vsyncpa [#allocation9], 0 }
   0x6   :  { %17 = vsyncpa [#allocation4], 0 }
   0x7   :  { %19 = vsyncpa [#allocation4 + $0x1], 0  ;;  %s1651_s24 = smov 0   ;;  %s1653_s25 = smov 0  }
   0x8   :  { %s1655_s26 = smov 0   ;;  %s1657_s27 = smov 0  }
   0x9 LB: > { %s1672_s28 = sadd.s32 4294967295, %s1600_s27   ;;  %s1092_s29 = sadd.s32 4294967294, %s1600_s27   ;;  %s1600_s27 = sphi %s1657_s27, %s1944_s27   ;;  %s1596_s26 = sphi %s1655_s26, %s1943_s26   ;;  %s1592_s25 = sphi %s1653_s25, %s1942_s25   ;;  %s1588_s24 = sphi %s1651_s24, %s1941_s24  }
   0xa   : > { %p45_p0 = scmp.ne.s32.totalorder %s1592_s25, %s1588_s24  ;;  %p1916_p1 = scmp.eq.s32.totalorder %s1672_s28, 0 }
   0xb   : > { %p195_p2 = scmp.eq.s32.totalorder %s1672_s28, 1  ;;  %p201_p3 = scmp.eq.s32.totalorder %s1092_s29, 1 }
   0xc   : > { %p1681_p4 = por %p1916_p1, %p45_p0  ;;  %p1093_p5 = scmp.ge.s32.totalorder %s1600_s27, 1 }
   0xd   : > { %p1686_p6 = por %p201_p3, %p45_p0  ;;  %p208_p7 = scmp.lt.s32.totalorder %s1600_s27, 3 }
   0xe   : > { %s1923_s30 = scalar_select %p1681_p4, 1, 0 }
   0xf   : > { %s1924_s8 = scalar_select %p1686_p6, 1, 0 }
  0x10   : > { %p1691_p8 = pnand %p1093_p5, %p208_p7  ;;  %s1602_s10 = smov [#allocation5]  }
  0x11   : > { %s220_s11 = sshll.u32 %s1602_s10, 4  ;;  %s1603_s13 = smov [#allocation7]   ;;  %s221_s11 = int_to_ptr.vmem [resolvable:$true] %s220_s11 }
  0x12   : > { %s1925_s9 = scalar_select %p1691_p8, 1, 0 }
  0x13   : > { %p1325_p9 = pneg %p1691_p8  ;;  %s236_s14 = sshll.u32 %s1603_s13, 4  ;;  %s237_s14 = int_to_ptr.vmem [resolvable:$true] %s236_s14 }
  0x14   : > { %s1604_s15 = smov [#allocation8]   ;;  %s1433_s17 = scalar_lea.vmem %s221_s11, 1024 }
  0x15   : > { %p1700_p11 = pnand %p1325_p9, %p1916_p1  ;;  %s252_s16 = sshll.u32 %s1604_s15, 4  ;;  %s253_s16 = int_to_ptr.vmem [resolvable:$true] %s252_s16 }
  0x16   : > { %p1434_p13 = scmp.ne.s32.totalorder %s221_s11, %s1433_s17  ;;  %p1441_p5 = scmp.lt.s32.totalorder %s221_s11, %s221_s11 }
  0x17   : > { %p1424_p12 = pneg %p1700_p11  ;;  %p1442_p7 = scmp.lt.s32.totalorder %s1433_s17, %s1433_s17 }
  0x19   : > { %p1436_p0 = pnand %p1434_p13, %p1424_p12  ;;  %p1443_p9 = por %p1442_p7, %p1441_p5 }
  0x1b   : > { %p1437_p3 = pneg %p1436_p0 }
  0x1d   : > { %p1444_p10 = pnand %p1443_p9, %p1437_p3 }
  0x1f   : > { %1447 = shalt.err (!%p1444_p10)
}
  0x20   : > { %s1917_s18 = smov 64   ;;  %s1918_s19 = smov 4  }
  0x21   : > { %s1927_s1 = sld [smem:[#allocation15_spill]]  ;;  %s1459_s22 = scalar_lea.vmem %s237_s14, 1024 }
  0x22   : > { %p1460_p13 = scmp.ne.s32.totalorder %s237_s14, %s1459_s22  ;;  %p1467_p3 = scmp.lt.s32.totalorder %s237_s14, %s237_s14 }
  0x23   : > { %p1468_p10 = scmp.lt.s32.totalorder %s1459_s22, %s1459_s22 }
  0x24   : > { %p1462_p0 = pnand %p1460_p13, %p1424_p12 }
  0x25   : > { %p1469_p7 = por %p1468_p10, %p1467_p3 }
  0x26   : > { %p1463_p5 = pneg %p1462_p0 }
  0x27   : > { %1328 = dma.hbm_to_vmem [thread:$0]  (!%p1700_p11), %s1927_s1, 1024, %s221_s11, [#allocation6], %s1917_s18, %s1917_s18, %s1918_s19  }
  0x28   : > { %p1470_p9 = pnand %p1469_p7, %p1463_p5 }
  0x2a   : > { %1473 = shalt.err (!%p1470_p9)
}
  0x2b   : > { %1331 = dma.hbm_to_vmem [thread:$0]  (!%p1700_p11), %s1911_s3, 1024, %s237_s14, [#allocation6], %s1917_s18, %s1917_s18, %s1918_s19  }
  0x2c   : > { %s1485_s10 = scalar_lea.vmem %s253_s16, 1024  ;;  %p1493_p3 = scmp.lt.s32.totalorder %s253_s16, %s253_s16 }
  0x2d   : > { %p1486_p1 = scmp.ne.s32.totalorder %s253_s16, %s1485_s10  ;;  %p1494_p5 = scmp.lt.s32.totalorder %s1485_s10, %s1485_s10 }
  0x2f   : > { %p1488_p13 = pnand %p1486_p1, %p1424_p12  ;;  %p1495_p10 = por %p1494_p5, %p1493_p3 }
  0x31   : > { %p1489_p0 = pneg %p1488_p13 }
  0x33   : > { %p1496_p7 = pnand %p1495_p10, %p1489_p0 }
  0x35   : > { %1499 = shalt.err (!%p1496_p7)
}
  0x36   : > { %1334 = dma.hbm_to_vmem [thread:$0]  (!%p1700_p11), %s1913_s5, 1024, %s253_s16, [#allocation9], %s1917_s18, %s1917_s18, %s1918_s19  }
  0x37   : > { %s1740_s14 = sadd.s32 1, %s1600_s27   ;;  %s32_s15 = sadd.s32 1, %s1596_s26 }
  0x38   : > { %s29_s12 = ssub.s32 %s1600_s27, %s1740_s14  ;;  %p39_p12 = scmp.ne.s32.totalorder %s1596_s26, %s1592_s25 }
  0x39   : > { %p30_p1 = scmp.eq.s32.totalorder %s29_s12, 0  ;;  %p40_p9 = scmp.eq.s32.totalorder %s1600_s27, 0 }
  0x3a   : > { %p1346_p13 = scmp.lt.s32.totalorder %s1600_s27, 2  ;;  %p1754_p3 = por %p195_p2, %p39_p12 }
  0x3b   : > { %s1750_s17 = scalar_select %p30_p1, %s1596_s26, %s32_s15  }
  0x3c   : > { %p41_p0 = por %p40_p9, %p39_p12  ;;  %s269_s21 = sand.u32 1, %s1596_s26  }
  0x3d   : > { %s1928_s20 = scalar_select %p1754_p3, 1, 0 }
  0x3e   : > { %s1147_s22 = sshll.u32 %s1600_s27, 10  ;;  %s1098_s16 = sshll.u32 %s269_s21, 6 }
  0x3f   : > { %s1763_s10 = scalar_lea.hbm %s1908_s0, %s1147_s22  ;;  %s273_s11 = scalar_lea.vmem [#allocation2], %s1098_s16 }
  0x40   : > { %s280_s13 = sshll.u32 %s273_s11, 4  ;;  %p1765_p11 = pnand %p1346_p13, %p41_p0  ;;  %s1769_s13 = int_to_ptr.vmem [resolvable:$true] %s280_s13 }
  0x41   : > { %s1771_s15 = scalar_lea.sflag [#allocation3], %s269_s21  ;;  %s1500_s18 = scalar_lea.hbm %s1763_s10, 1024 }
  0x42   : > { %p1501_p2 = scmp.ne.s32.totalorder %s1763_s10, %s1500_s18  ;;  %p1502_p5 = pneg %p1765_p11 }
  0x43   : > { %s1505_s16 = scalar_lea.hbm %s1908_s0, 2048  ;;  %p1506_p1 = scmp.lt.s32.totalorder %s1763_s10, %s1908_s0 }
  0x44   : > { %p1503_p10 = pnand %p1502_p5, %p1501_p2  ;;  %p1507_p12 = scmp.lt.s32.totalorder %s1505_s16, %s1500_s18 }
  0x46   : > { %p1504_p7 = pneg %p1503_p10  ;;  %p1508_p9 = por %p1507_p12, %p1506_p1 }
  0x48   : > { %p1509_p13 = pnand %p1508_p9, %p1504_p7 }
  0x4a   : > { %1512 = shalt.err (!%p1509_p13)
}
  0x4b   : > { %s1513_s21 = scalar_lea.vmem %s1769_s13, 1024  ;;  %s1607_s19 = smov [#allocation2]  }
  0x4c   : > { %p1514_p0 = scmp.ne.s32.totalorder %s1769_s13, %s1513_s21  ;;  %s1518_s1 = sshll.u32 %s1607_s19, 4  ;;  %s1519_s1 = int_to_ptr.vmem [resolvable:$false] %s1518_s1 }
  0x4d   : > { %s1520_s22 = scalar_lea.vmem %s1519_s1, 2048  ;;  %p1521_p10 = scmp.lt.s32.totalorder %s1769_s13, %s1519_s1 }
  0x4e   : > { %p1516_p6 = pnand %p1514_p0, %p1502_p5  ;;  %p1522_p3 = scmp.lt.s32.totalorder %s1520_s22, %s1513_s21 }
  0x50   : > { %p1517_p2 = pneg %p1516_p6  ;;  %p1523_p4 = por %p1522_p3, %p1521_p10 }
  0x52   : > { %p1524_p8 = pnand %p1523_p4, %p1517_p2 }
  0x54   : > { %1527 = shalt.err (!%p1524_p8)
}
  0x55   : > { %s1930_s18 = smov 4   ;;  %s1931_s23 = smov 64  }
  0x56   : > { %1338 = dma.hbm_to_vmem [thread:$0]  (!%p1765_p11), %s1763_s10, 1024, %s1769_s13, %s1771_s15, %s1931_s23, %s1931_s23, %s1930_s18  }
  0x57   : > { %p1932_p6 = scmp.ne.s32.totalorder %s1925_s9, 0 }
  0x58   : > { %s1798_s19 = sand.u32 (!%p1932_p6), 1, %s1592_s25   ;;  %p1933_p4 = scmp.ne.s32.totalorder (!%p1932_p6), %s1923_s30, 0 }
  0x59   : > { %292 = sbr.rel (%p1932_p6) target bundleno = 786 (0x312), region = 48  ;;  %s1102_s1 = sshll.u32 (!%p1932_p6), %s1798_s19, 6 }
  0x5a   : > { %s295_s16 = scalar_lea.sflag (!%p1932_p6), [#allocation3], %s1798_s19  ;;  %s1802_s29 = scalar_lea.vmem (!%p1932_p6), [#allocation2], %s1102_s1 }
  0x5e   : > { %1571 = dma.done.wait (%p1933_p4), %s295_s16, 1024  }
  0x5f   : > { %1573 = vsyncadd (%p1933_p4), %s295_s16, 4294966272  ;;  %p1934_p8 = scmp.eq.s32.totalorder %s1672_s28, 0 }
  0x61   : > { %1575 = dma.done.wait (%p1934_p8), [#allocation6], 2048   ;;  %p1935_p3 = pmov %p1934_p8 }
  0x63   : > { %1577 = vsyncadd (%p1935_p3), [#allocation6], 4294965248  ;;  %p1936_p11 = pmov %p1935_p3 }
  0x64   : > { %p1937_p5 = pmov %p1935_p3 }
  0x65   : > { %1579 = dma.done.wait (%p1936_p11), [#allocation9], 1024  }
  0x66   : > { %1581 = vsyncadd (%p1937_p5), [#allocation9], 4294966272  ;;  %v1390_v0 = vld [vmem:[#allocation5 + $0x38] sm:$0xff]   ;;  %v1391_v1 = vld [vmem:[#allocation5 + $0x30] sm:$0xff]   ;;  %s1106_s12 = sshll.u32 %s1798_s19, 7  ;;  %s1148_s22 = sshll.u32 %s1672_s28, 11 }
  0x67   : > { %1197 = vmatprep.subr.bf16.mxu0 %v1390_v0  ;;  %v1392_v2 = vld [vmem:[#allocation5 + $0x28] sm:$0xff]   ;;  %v1393_v3 = vld [vmem:[#allocation5 + $0x20] sm:$0xff]   ;;  %v1394_v5 = vld [vmem:[#allocation5 + $0x18] sm:$0xff]   ;;  %s1840_s21 = scalar_lea.vmem [#allocation10], %s1106_s12  ;;  %s1861_s16 = scalar_lea.hbm %s1915_s7, %s1148_s22 }
  0x68   : > { %1198 = vmatpush3.bf16.msra.mxu0 %v1390_v0  ;;  %v1398_v4 = vld [vmem:[%s1802_s29] sm:$0xff]   ;;  %v1395_v6 = vld [vmem:[#allocation5 + $0x10] sm:$0xff]   ;;  %v1406_v7 = vld [vmem:[#allocation7 + $0x38] sm:$0xff]   ;;  %s990_s18 = sshll.u32 %s1840_s21, 4  ;;  %p1938_p1 = scmp.ne.s32.totalorder %s1928_s20, 0  ;;  %s1863_s18 = int_to_ptr.vmem [resolvable:$true] %s990_s18 }
  0x69   : > { %1199 = vmatprep.subr.bf16.mxu0 %v1391_v1  ;;  %1213 = vmatprep.mubr.bf16.mxu0 %v1398_v4  ;;  %v1407_v8 = vld [vmem:[#allocation7 + $0x30] sm:$0xff]   ;;  %v1396_v9 = vld [vmem:[#allocation5 + $0x8] sm:$0xff]   ;;  %v1397_v11 = vld [vmem:[#allocation5] sm:$0xff]   ;;  %s1528_s28 = scalar_lea.vmem %s1863_s18, 2048  ;;  %s1608_s30 = smov [#allocation10]  }
  0x6a   : > { %1229 = vmatprep.subr.bf16.mxu1 %v1406_v7  ;;  %v1408_v10 = vld [vmem:[#allocation7 + $0x28] sm:$0xff]   ;;  %v1409_v12 = vld [vmem:[#allocation7 + $0x20] sm:$0xff]   ;;  %v1410_v13 = vld [vmem:[#allocation7 + $0x18] sm:$0xff]   ;;  %p1529_p7 = scmp.ne.s32.totalorder %s1863_s18, %s1528_s28  ;;  %s1532_s9 = sshll.u32 %s1608_s30, 4  ;;  %s1533_s9 = int_to_ptr.vmem [resolvable:$false] %s1532_s9 }
  0x6b   : > { %1230 = vmatpush3.bf16.msra.mxu1 %v1406_v7  ;;  %v1399_v14 = vld [vmem:[%s1802_s29 + $0x8] sm:$0xff]   ;;  %v1400_v15 = vld [vmem:[%s1802_s29 + $0x10] sm:$0xff]   ;;  %v1401_v16 = vld [vmem:[%s1802_s29 + $0x18] sm:$0xff]   ;;  %s1534_s10 = scalar_lea.vmem %s1533_s9, 4096  ;;  %p1535_p13 = scmp.lt.s32.totalorder %s1863_s18, %s1533_s9 }
  0x6c   : > { %1200 = vmatpush3.bf16.msra.mxu0 %v1391_v1  ;;  %1231 = vmatprep.subr.bf16.mxu1 %v1407_v8  ;;  %v1402_v17 = vld [vmem:[%s1802_s29 + $0x20] sm:$0xff]   ;;  %v1403_v18 = vld [vmem:[%s1802_s29 + $0x28] sm:$0xff]   ;;  %v1404_v19 = vld [vmem:[%s1802_s29 + $0x30] sm:$0xff]   ;;  %p1530_p12 = pnand %p1529_p7, %p1938_p1  ;;  %p1536_p0 = scmp.lt.s32.totalorder %s1534_s10, %s1528_s28 }
  0x6d   : > { %1201 = vmatprep.subr.bf16.mxu0 %v1392_v2  ;;  %v1405_v20 = vld [vmem:[%s1802_s29 + $0x38] sm:$0xff]   ;;  %v1411_v21 = vld [vmem:[#allocation7 + $0x10] sm:$0xff]   ;;  %v1412_v22 = vld [vmem:[#allocation7 + $0x8] sm:$0xff]   ;;  %s977_s29 = scalar_lea.sflag [#allocation4], %s1798_s19 }
  0x6e   : > { %v1413_v23 = vld [vmem:[#allocation7] sm:$0xff]   ;;  %v1414_v24 = vld [vmem:[#allocation8 + $0x38] sm:$0xff]   ;;  %v1415_v25 = vld [vmem:[#allocation8 + $0x30] sm:$0xff]   ;;  %p1531_p9 = pneg %p1530_p12  ;;  %p1537_p2 = por %p1536_p0, %p1535_p13 }
  0x6f   : > { %1232 = vmatpush3.bf16.msra.mxu1 %v1407_v8  ;;  %v1416_v26 = vld [vmem:[#allocation8 + $0x28] sm:$0xff]   ;;  %v1417_v27 = vld [vmem:[#allocation8 + $0x20] sm:$0xff]   ;;  %v1824_v28 = vld [vmem:[#allocation8 + $0x18] sm:$0xff]  }
  0x70   : > { %1202 = vmatpush3.bf16.msra.mxu0 %v1392_v2  ;;  %1233 = vmatprep.subr.bf16.mxu1 %v1408_v10  ;;  %v1107_v31 = vld [vmem:[%s1910_s2] ss:$0 sm:$0xff]  ;;  %p1538_p10 = pnand %p1537_p2, %p1531_p9 }
  0x71   : > { %1203 = vmatprep.subr.bf16.mxu0 %v1393_v3 }
  0x73   : > { %1234 = vmatpush3.bf16.msra.mxu1 %v1408_v10 }
  0x74   : > { %1204 = vmatpush3.bf16.msra.mxu0 %v1393_v3  ;;  %1235 = vmatprep.subr.bf16.mxu1 %v1409_v12 }
  0x75   : > { %1205 = vmatprep.subr.bf16.mxu0 %v1394_v5 }
  0x77   : > { %1236 = vmatpush3.bf16.msra.mxu1 %v1409_v12 }
  0x78   : > { %1206 = vmatpush3.bf16.msra.mxu0 %v1394_v5  ;;  %1237 = vmatprep.subr.bf16.mxu1 %v1410_v13 }
  0x79   : > { %1207 = vmatprep.subr.bf16.mxu0 %v1395_v6 }
  0x7b   : > { %1238 = vmatpush3.bf16.msra.mxu1 %v1410_v13 }
  0x7c   : > { %1208 = vmatpush3.bf16.msra.mxu0 %v1395_v6  ;;  %1239 = vmatprep.subr.bf16.mxu1 %v1411_v21 }
  0x7d   : > { %1209 = vmatprep.subr.bf16.mxu0 %v1396_v9 }
  0x7f   : > { %1240 = vmatpush3.bf16.msra.mxu1 %v1411_v21 }
  0x80   : > { %1210 = vmatpush3.bf16.msra.mxu0 %v1396_v9  ;;  %1241 = vmatprep.subr.bf16.mxu1 %v1412_v22 }
  0x81   : > { %1211 = vmatprep.subr.bf16.mxu0 %v1397_v11 }
  0x83   : > { %1242 = vmatpush3.bf16.msra.mxu1 %v1412_v22  ;;  %v1419_v22 = vld [vmem:[#allocation8 + $0x10] sm:$0xff]  }
  0x84   : > { %1212 = vmatpush3.bf16.msra.mxu0 %v1397_v11  ;;  %1243 = vmatprep.subr.bf16.mxu1 %v1413_v23 }
  0x85   : > { %1261 = vmatprep.subr.bf16.mxu0 %v1414_v24 }
  0x87   : > { %1214 = vmatmul.mubr.bf16.vlgmr.msra.gmra.mxu0 %v1399_v14  ;;  %1244 = vmatpush3.bf16.msra.mxu1 %v1413_v23  ;;  %v1420_v23 = vld [vmem:[#allocation8 + $0x8] sm:$0xff]  }
  0x88   : > { %1217 = vmatprep.mubr.bf16.mxu0 %v1400_v15  ;;  %1293 = vmatprep.subr.bf16.mxu1 %v1414_v24 }
  0x89   : > { %1262 = vmatpush3.bf16.msra.mxu0 %v1414_v24 }
  0x8a   : > { %1263 = vmatprep.subr.bf16.mxu0 %v1415_v25 }
  0x8d   : > { %1264 = vmatpush3.bf16.msra.mxu0 %v1415_v25 }
  0x8e   : > { %1265 = vmatprep.subr.bf16.mxu0 %v1416_v26 }
  0x8f   : > { %1218 = vmatmul.mubr.bf16.gmra.mxu0 %v1401_v16 }
  0x90   : > { %1221 = vmatprep.mubr.bf16.mxu0 %v1402_v17 }
  0x91   : > { %1266 = vmatpush3.bf16.msra.mxu0 %v1416_v26 }
  0x92   : > { %1267 = vmatprep.subr.bf16.mxu0 %v1417_v27 }
  0x95   : > { %1268 = vmatpush3.bf16.msra.mxu0 %v1417_v27 }
  0x96   : > { %1269 = vmatprep.subr.bf16.mxu0 %v1824_v28 }
  0x97   : > { %1222 = vmatmul.mubr.bf16.gmra.mxu0 %v1403_v18 }
  0x98   : > { %1225 = vmatprep.mubr.bf16.mxu0 %v1404_v19 }
  0x99   : > { %1270 = vmatpush3.bf16.msra.mxu0 %v1824_v28 }
  0x9a   : > { %1271 = vmatprep.subr.bf16.mxu0 %v1419_v22 }
  0x9d   : > { %1272 = vmatpush3.bf16.msra.mxu0 %v1419_v22 }
  0x9e   : > { %1273 = vmatprep.subr.bf16.mxu0 %v1420_v23 }
  0x9f   : > { %1226 = vmatmul.mubr.bf16.gmra.mxu0 %v1405_v20 }
  0xa1   : > { %1274 = vmatpush3.bf16.msra.mxu0 %v1420_v23 }
 0x147   : > { %v1215_v29 = vpop.f32.mrf.mxu0 }
 0x148   : > { %v522_v35 = vadd.f32 %v1215_v29, %v1107_v31 }
 0x149   : > { %v513_v30 = vpop.f32.mrf.mxu0 }
 0x14a   : > { %v514_v33 = vadd.f32 %v1107_v31, %v513_v30  ;;  %v578_v42 = vmax.f32 %v522_v35, 0.0 }
 0x14b   : > { %v1216_v32 = vpop.f32.mrf.mxu0 }
 0x14c   : > { %v525_v34 = vadd.f32 %v1216_v32, %v1107_v31  ;;  %v576_v40 = vmax.f32 %v514_v33, 0.0 }
 0x14d   : > { %v516_v36 = vpop.f32.mrf.mxu0 }
 0x14e   : > { %v517_v37 = vadd.f32 %v1107_v31, %v516_v36  ;;  %v579_v38 = vmax.f32 %v525_v34, 0.0 }
 0x14f   : > { %v1219_v39 = vpop.f32.mrf.mxu0 }
 0x150   : > { %v577_v41 = vmax.f32 %v517_v37, 0.0  ;;  %v593_v45 = vpack.c.bf16 %v579_v38, %v578_v42  ;;  %v538_v49 = vadd.f32 %v1219_v39, %v1107_v31 }
 0x151   : > { %v529_v43 = vpop.f32.mrf.mxu0 }
 0x152   : > { %v592_v44 = vpack.c.bf16 %v577_v41, %v576_v40  ;;  %v530_v47 = vadd.f32 %v1107_v31, %v529_v43  ;;  %v582_v56 = vmax.f32 %v538_v49, 0.0 }
 0x153   : > { %v1220_v46 = vpop.f32.mrf.mxu0 }
 0x154   : > { %v541_v48 = vadd.f32 %v1220_v46, %v1107_v31  ;;  %1245 = vmatprep.mubr.bf16.mxu1 %v592_v44  ;;  %v580_v54 = vmax.f32 %v530_v47, 0.0 }
 0x155   : > { %v532_v50 = vpop.f32.mrf.mxu0  ;;  %1246 = vmatmul.mubr.bf16.vlgmr.msra.gmra.mxu1 %v593_v45 }
 0x156   : > { %v533_v51 = vadd.f32 %v1107_v31, %v532_v50  ;;  %1301 = vmatpush3.bf16.msra.mxu1 %v1414_v24  ;;  %v583_v52 = vmax.f32 %v541_v48, 0.0  ;;  %v1421_v24 = vld [vmem:[#allocation8] sm:$0xff]  }
 0x157   : > { %v1223_v53 = vpop.f32.mrf.mxu0  ;;  %1294 = vmatprep.subr.bf16.mxu1 %v1415_v25  ;;  %1275 = vmatprep.subr.bf16.mxu0 %v1421_v24 }
 0x158   : > { %v581_v55 = vmax.f32 %v533_v51, 0.0  ;;  %v595_v59 = vpack.c.bf16 %v583_v52, %v582_v56  ;;  %v554_v63 = vadd.f32 %v1223_v53, %v1107_v31  ;;  %1276 = vmatpush3.bf16.msra.mxu0 %v1421_v24 }
 0x159   : > { %v545_v57 = vpop.f32.mrf.mxu0 }
 0x15a   : > { %v594_v58 = vpack.c.bf16 %v581_v55, %v580_v54  ;;  %1302 = vmatpush3.bf16.msra.mxu1 %v1415_v25  ;;  %v546_v61 = vadd.f32 %v1107_v31, %v545_v57  ;;  %v586_v6 = vmax.f32 %v554_v63, 0.0 }
 0x15b   : > { %v1224_v60 = vpop.f32.mrf.mxu0  ;;  %1295 = vmatprep.subr.bf16.mxu1 %v1416_v26 }
 0x15c   : > { %v557_v62 = vadd.f32 %v1224_v60, %v1107_v31  ;;  %1249 = vmatprep.mubr.bf16.mxu1 %v594_v58  ;;  %v584_v4 = vmax.f32 %v546_v61, 0.0 }
 0x15d   : > { %v548_v0 = vpop.f32.mrf.mxu0  ;;  %1250 = vmatmul.mubr.bf16.gmra.mxu1 %v595_v59 }
 0x15e   : > { %v549_v1 = vadd.f32 %v1107_v31, %v548_v0  ;;  %1303 = vmatpush3.bf16.msra.mxu1 %v1416_v26  ;;  %v587_v2 = vmax.f32 %v557_v62, 0.0 }
 0x15f   : > { %v1227_v3 = vpop.f32.mrf.mxu0  ;;  %1296 = vmatprep.subr.bf16.mxu1 %v1417_v27 }
 0x160   : > { %v585_v5 = vmax.f32 %v549_v1, 0.0  ;;  %v597_v9 = vpack.c.bf16 %v587_v2, %v586_v6  ;;  %v570_v13 = vadd.f32 %v1227_v3, %v1107_v31 }
 0x161   : > { %v561_v7 = vpop.f32.mrf.mxu0 }
 0x162   : > { %v596_v8 = vpack.c.bf16 %v585_v5, %v584_v4  ;;  %1304 = vmatpush3.bf16.msra.mxu1 %v1417_v27  ;;  %v562_v11 = vadd.f32 %v1107_v31, %v561_v7  ;;  %v590_v19 = vmax.f32 %v570_v13, 0.0  ;;  %v1124_v27 = vld [vmem:[%s1912_s4] ss:$0 sm:$0xff] }
 0x163   : > { %v1228_v10 = vpop.f32.mrf.mxu0  ;;  %1297 = vmatprep.subr.bf16.mxu1 %v1824_v28 }
 0x164   : > { %v573_v12 = vadd.f32 %v1228_v10, %v1107_v31  ;;  %1253 = vmatprep.mubr.bf16.mxu1 %v596_v8  ;;  %v588_v17 = vmax.f32 %v562_v11, 0.0 }
 0x165   : > { %v564_v14 = vpop.f32.mrf.mxu0  ;;  %1254 = vmatmul.mubr.bf16.gmra.mxu1 %v597_v9 }
 0x166   : > { %v565_v15 = vadd.f32 %v1107_v31, %v564_v14  ;;  %1305 = vmatpush3.bf16.msra.mxu1 %v1824_v28  ;;  %v591_v16 = vmax.f32 %v573_v12, 0.0 }
 0x167   : > { %1298 = vmatprep.subr.bf16.mxu1 %v1419_v22 }
 0x168   : > { %v589_v18 = vmax.f32 %v565_v15, 0.0  ;;  %v599_v21 = vpack.c.bf16 %v591_v16, %v590_v19 }
 0x16a   : > { %v598_v20 = vpack.c.bf16 %v589_v18, %v588_v17  ;;  %1306 = vmatpush3.bf16.msra.mxu1 %v1419_v22  ;;  %v1133_v18 = vld [vmem:[%s1914_s6] ss:$0 sm:$0xff] }
 0x16b   : > { %1299 = vmatprep.subr.bf16.mxu1 %v1420_v23 }
 0x16c   : > { %1257 = vmatprep.mubr.bf16.mxu1 %v598_v20 }
 0x16d   : > { %1258 = vmatmul.mubr.bf16.gmra.mxu1 %v599_v21 }
 0x16e   : > { %1307 = vmatpush3.bf16.msra.mxu1 %v1420_v23 }
 0x16f   : > { %1300 = vmatprep.subr.bf16.mxu1 %v1421_v24 }
 0x172   : > { %1308 = vmatpush3.bf16.msra.mxu1 %v1421_v24 }
 0x215   : > { %v1247_v25 = vpop.f32.mrf.mxu1 }
 0x216   : > { %v714_v31 = vadd.f32 %v1247_v25, %v1124_v27 }
 0x217   : > { %v705_v26 = vpop.f32.mrf.mxu1 }
 0x218   : > { %v706_v29 = vadd.f32 %v1124_v27, %v705_v26  ;;  %v770_v38 = vmax.f32 %v714_v31, 0.0 }
 0x219   : > { %v1248_v28 = vpop.f32.mrf.mxu1 }
 0x21a   : > { %v717_v30 = vadd.f32 %v1248_v28, %v1124_v27  ;;  %v768_v36 = vmax.f32 %v706_v29, 0.0 }
 0x21b   : > { %v708_v32 = vpop.f32.mrf.mxu1 }
 0x21c   : > { %v709_v33 = vadd.f32 %v1124_v27, %v708_v32  ;;  %v771_v34 = vmax.f32 %v717_v30, 0.0 }
 0x21d   : > { %v1251_v35 = vpop.f32.mrf.mxu1 }
 0x21e   : > { %v769_v37 = vmax.f32 %v709_v33, 0.0  ;;  %v785_v41 = vpack.c.bf16 %v771_v34, %v770_v38  ;;  %v730_v45 = vadd.f32 %v1251_v35, %v1124_v27 }
 0x21f   : > { %v721_v39 = vpop.f32.mrf.mxu1 }
 0x220   : > { %v784_v40 = vpack.c.bf16 %v769_v37, %v768_v36  ;;  %v722_v43 = vadd.f32 %v1124_v27, %v721_v39  ;;  %v774_v52 = vmax.f32 %v730_v45, 0.0 }
 0x221   : > { %v1252_v42 = vpop.f32.mrf.mxu1 }
 0x222   : > { %v733_v44 = vadd.f32 %v1252_v42, %v1124_v27  ;;  %1277 = vmatprep.mubr.bf16.mxu0 %v784_v40  ;;  %v772_v50 = vmax.f32 %v722_v43, 0.0 }
 0x223   : > { %v724_v46 = vpop.f32.mrf.mxu1  ;;  %1278 = vmatmul.mubr.bf16.vlgmr.msra.gmra.mxu0 %v785_v41 }
 0x224   : > { %v725_v47 = vadd.f32 %v1124_v27, %v724_v46  ;;  %v775_v48 = vmax.f32 %v733_v44, 0.0 }
 0x225   : > { %v1255_v49 = vpop.f32.mrf.mxu1 }
 0x226   : > { %v773_v51 = vmax.f32 %v725_v47, 0.0  ;;  %v787_v55 = vpack.c.bf16 %v775_v48, %v774_v52  ;;  %v746_v59 = vadd.f32 %v1255_v49, %v1124_v27 }
 0x227   : > { %v737_v53 = vpop.f32.mrf.mxu1 }
 0x228   : > { %v786_v54 = vpack.c.bf16 %v773_v51, %v772_v50  ;;  %v738_v57 = vadd.f32 %v1124_v27, %v737_v53  ;;  %v778_v2 = vmax.f32 %v746_v59, 0.0 }
 0x229   : > { %v1256_v56 = vpop.f32.mrf.mxu1 }
 0x22a   : > { %v749_v58 = vadd.f32 %v1256_v56, %v1124_v27  ;;  %1281 = vmatprep.mubr.bf16.mxu0 %v786_v54  ;;  %v776_v0 = vmax.f32 %v738_v57, 0.0 }
 0x22b   : > { %v740_v60 = vpop.f32.mrf.mxu1  ;;  %1282 = vmatmul.mubr.bf16.gmra.mxu0 %v787_v55 }
 0x22c   : > { %v741_v61 = vadd.f32 %v1124_v27, %v740_v60  ;;  %v779_v62 = vmax.f32 %v749_v58, 0.0 }
 0x22d   : > { %v1259_v63 = vpop.f32.mrf.mxu1 }
 0x22e   : > { %v777_v1 = vmax.f32 %v741_v61, 0.0  ;;  %v789_v5 = vpack.c.bf16 %v779_v62, %v778_v2  ;;  %v762_v9 = vadd.f32 %v1259_v63, %v1124_v27 }
 0x22f   : > { %v753_v3 = vpop.f32.mrf.mxu1 }
 0x230   : > { %v788_v4 = vpack.c.bf16 %v777_v1, %v776_v0  ;;  %v754_v7 = vadd.f32 %v1124_v27, %v753_v3  ;;  %v782_v15 = vmax.f32 %v762_v9, 0.0 }
 0x231   : > { %v1260_v6 = vpop.f32.mrf.mxu1 }
 0x232   : > { %v765_v8 = vadd.f32 %v1260_v6, %v1124_v27  ;;  %1285 = vmatprep.mubr.bf16.mxu1 %v788_v4  ;;  %v780_v13 = vmax.f32 %v754_v7, 0.0 }
 0x233   : > { %v756_v10 = vpop.f32.mrf.mxu1  ;;  %1286 = vmatmul.mubr.bf16.vlgmr.msra.gmra.mxu1 %v789_v5 }
 0x234   : > { %v757_v11 = vadd.f32 %v1124_v27, %v756_v10  ;;  %v783_v12 = vmax.f32 %v765_v8, 0.0 }
 0x236   : > { %v781_v14 = vmax.f32 %v757_v11, 0.0  ;;  %v791_v17 = vpack.c.bf16 %v783_v12, %v782_v15 }
 0x238   : > { %v790_v16 = vpack.c.bf16 %v781_v14, %v780_v13 }
 0x23a   : > { %1289 = vmatprep.mubr.bf16.mxu1 %v790_v16 }
 0x23b   : > { %1290 = vmatmul.mubr.bf16.gmra.mxu1 %v791_v17 }
 0x2e3   : > { %v1279_v19 = vpop.f32.mrf.mxu0 }
 0x2e4   : > { %v906_v20 = vadd.f32 %v1279_v19, %v1133_v18 }
 0x2e5   : > { %v897_v21 = vpop.f32.mrf.mxu0 }
 0x2e6   : > { %962 = vst [vmem:[%s1840_s21 + $0x10] sm:$0xff] %v906_v20  ;;  %v898_v22 = vadd.f32 %v1133_v18, %v897_v21 }
 0x2e7   : > { %v1280_v23 = vpop.f32.mrf.mxu0 }
 0x2e8   : > { %960 = vst [vmem:[%s1840_s21] sm:$0xff] %v898_v22  ;;  %v909_v24 = vadd.f32 %v1280_v23, %v1133_v18 }
 0x2e9   : > { %v900_v25 = vpop.f32.mrf.mxu0 }
 0x2ea   : > { %963 = vst [vmem:[%s1840_s21 + $0x18] sm:$0xff] %v909_v24  ;;  %v901_v26 = vadd.f32 %v1133_v18, %v900_v25 }
 0x2eb   : > { %v1283_v27 = vpop.f32.mrf.mxu0 }
 0x2ec   : > { %961 = vst [vmem:[%s1840_s21 + $0x8] sm:$0xff] %v901_v26  ;;  %v922_v28 = vadd.f32 %v1283_v27, %v1133_v18 }
 0x2ed   : > { %v913_v29 = vpop.f32.mrf.mxu0 }
 0x2ee   : > { %966 = vst [vmem:[%s1840_s21 + $0x30] sm:$0xff] %v922_v28  ;;  %v914_v30 = vadd.f32 %v1133_v18, %v913_v29 }
 0x2ef   : > { %v1284_v31 = vpop.f32.mrf.mxu0 }
 0x2f0   : > { %964 = vst [vmem:[%s1840_s21 + $0x20] sm:$0xff] %v914_v30  ;;  %v925_v32 = vadd.f32 %v1284_v31, %v1133_v18 }
 0x2f1   : > { %v916_v33 = vpop.f32.mrf.mxu0 }
 0x2f2   : > { %967 = vst [vmem:[%s1840_s21 + $0x38] sm:$0xff] %v925_v32  ;;  %v917_v34 = vadd.f32 %v1133_v18, %v916_v33 }
 0x2f3   : > { %v1287_v35 = vpop.f32.mrf.mxu1 }
 0x2f4   : > { %965 = vst [vmem:[%s1840_s21 + $0x28] sm:$0xff] %v917_v34  ;;  %v938_v36 = vadd.f32 %v1287_v35, %v1133_v18 }
 0x2f5   : > { %v929_v37 = vpop.f32.mrf.mxu1 }
 0x2f6   : > { %970 = vst [vmem:[%s1840_s21 + $0x50] sm:$0xff] %v938_v36  ;;  %v930_v38 = vadd.f32 %v1133_v18, %v929_v37 }
 0x2f7   : > { %v1288_v39 = vpop.f32.mrf.mxu1 }
 0x2f8   : > { %968 = vst [vmem:[%s1840_s21 + $0x40] sm:$0xff] %v930_v38  ;;  %v941_v40 = vadd.f32 %v1288_v39, %v1133_v18 }
 0x2f9   : > { %v932_v41 = vpop.f32.mrf.mxu1 }
 0x2fa   : > { %971 = vst [vmem:[%s1840_s21 + $0x58] sm:$0xff] %v941_v40  ;;  %v933_v42 = vadd.f32 %v1133_v18, %v932_v41 }
 0x2fb   : > { %v1291_v43 = vpop.f32.mrf.mxu1 }
 0x2fc   : > { %969 = vst [vmem:[%s1840_s21 + $0x48] sm:$0xff] %v933_v42  ;;  %v954_v44 = vadd.f32 %v1291_v43, %v1133_v18 }
 0x2fd   : > { %v945_v45 = vpop.f32.mrf.mxu1 }
 0x2fe   : > { %974 = vst [vmem:[%s1840_s21 + $0x70] sm:$0xff] %v954_v44  ;;  %v946_v46 = vadd.f32 %v1133_v18, %v945_v45 }
 0x2ff   : > { %v1292_v47 = vpop.f32.mrf.mxu1 }
 0x300   : > { %972 = vst [vmem:[%s1840_s21 + $0x60] sm:$0xff] %v946_v46  ;;  %v957_v48 = vadd.f32 %v1292_v47, %v1133_v18 }
 0x301   : > { %v948_v49 = vpop.f32.mrf.mxu1 }
 0x302   : > { %975 = vst [vmem:[%s1840_s21 + $0x78] sm:$0xff] %v957_v48  ;;  %v949_v50 = vadd.f32 %v1133_v18, %v948_v49 }
 0x304   : > { %973 = vst [vmem:[%s1840_s21 + $0x68] sm:$0xff] %v949_v50 }
 0x305   : > { %1541 = shalt.err (!%p1538_p10)
}
 0x306   : > { %s1542_s13 = scalar_lea.hbm %s1861_s16, 2048  ;;  %s1546_s11 = scalar_lea.hbm %s1915_s7, 4096 }
 0x307   : > { %p1543_p6 = scmp.ne.s32.totalorder %s1861_s16, %s1542_s13  ;;  %p1547_p3 = scmp.lt.s32.totalorder %s1861_s16, %s1915_s7 }
 0x308   : > { %p1548_p11 = scmp.lt.s32.totalorder %s1546_s11, %s1542_s13 }
 0x309   : > { %p1544_p4 = pnand %p1543_p6, %p1938_p1 }
 0x30a   : > { %p1549_p5 = por %p1548_p11, %p1547_p3 }
 0x30b   : > { %p1545_p8 = pneg %p1544_p4 }
 0x30d   : > { %p1550_p7 = pnand %p1549_p5, %p1545_p8 }
 0x30f   : > { %1553 = shalt.err (!%p1550_p7)
}
 0x310   : > { %s1609_s23 = smov 128   ;;  %s1610_s1 = smov 8  }
 0x311   : > { %1323 = dma.vmem_to_hbm [thread:$0]  (%p1938_p1), %s1863_s18, 2048, %s1861_s16, %s977_s29, %s1609_s23, %s1609_s23, %s1610_s1  }
 0x312 PF: > { %s1005_s28 = sand.u32 1, %s1588_s24   ;;  %p1939_p12 = scmp.ne.s32.totalorder %s1924_s8, 0 }
 0x313   : > { %p1940_p9 = scmp.ge.s32.totalorder %s1600_s27, 2  ;;  %s1006_s30 = scalar_lea.sflag [#allocation4], %s1005_s28 }
 0x315   : > { %p1340_p13 = pnand %p1940_p9, %p1939_p12 }
 0x317   : > { %p1341_p0 = pneg %p1340_p13 }
 0x319   : > { %1583 = dma.done.wait (%p1341_p0), %s1006_s30, 2048  }
 0x31a   : > { %1585 = vsyncadd (%p1341_p0), %s1006_s30, 4294965248  ;;  %p22_p2 = scmp.ge.s32.totalorder %s1740_s14, 4   ;;  %s1941_s24 = smov %s1592_s25 }
 0x31b   : > { %s1942_s25 = smov %s1596_s26  ;;  %s1943_s26 = smov %s1750_s17 }
 0x31c   : > { %s1944_s27 = smov %s1740_s14  ;;  %24 = sbr.rel (!%p22_p2) target bundleno = 9 (0x9), region = 105 }
 0x321   :  { %1011 = vsyncpa [#allocation3], 1 }
 0x322   :  { %1013 = vsyncpa [#allocation3 + $0x1], 1 }
 0x323   :  { %1014 = vsyncpa [#allocation6], 1 }
 0x324   :  { %1015 = vsyncpa [#allocation9], 1 }
 0x325   :  { %1016 = vsyncpa [#allocation4], 1 }
 0x326   :  { %1018 = vsyncpa [#allocation4 + $0x1], 1 }

</bundles_post_ra>
